<compile_context>
chip_gen: v7x
topology: tpu7x:2x2x1
jax: 0.10.0
libtpu: 0.0.40
codegen_flags: <defaults>
</compile_context>

<pallas_src>
import jax
import jax.numpy as jnp
from jax import lax
from jax.experimental import pallas as pl
from jax.experimental.pallas import tpu as pltpu


B_PAD = 128    # queries per kernel call (lane-dense output row)
TOK_PAD = 128  # padded combined token table rows (entities + properties)
H_PAD = 128    # padded hidden width (lanes)


# ----------------------------- tokenizer (glue) -----------------------------
class MysteryTokenizer:
    def __init__(self):
        self.entity_tokens = ["Paris", "Rome", "Seattle"]
        self.property_tokens = ["language", "food", "country", "?"]
        self.output_tokens = [
            "France", "French", "steak", "Eiffel", "Italy", "Italian",
            "pizza", "Pisa", "USA", "English", "salmon", "Space Needle",
        ]

    def tokenize(self, text, type="input"):
        if type == "output":
            return self.output_tokens.index(text)
        if isinstance(text, str):
            text = text.split()
        assert text[0] in self.entity_tokens, f"{text[0]} is not a city"
        assert text[1] in self.property_tokens, f"{text[1]} is not a property of a city"
        return [self.entity_tokens.index(text[0]), self.property_tokens.index(text[1])]

    def decode(self, token_id, type="output"):
        if type == "output":
            token_list = self.output_tokens
        elif type == "entity":
            token_list = self.entity_tokens
        else:
            token_list = self.property_tokens
        if 0 <= token_id < len(token_list):
            return token_list[token_id]
        return "<unknown>"


# ------------------------------- Pallas kernel -------------------------------
def mystery_kernel(ent_ref, prop_ref, t2t_ref, bh_ref, wo_ref, out_ref):
    """Processes B_PAD queries in one step; output is lane-dense.

    ent_ref  : VMEM int32 (1, B_PAD)      entity token id per query (lanes)
    prop_ref : VMEM int32 (1, B_PAD)      property token id per query (lanes)
    t2t_ref  : VMEM f32 (H_PAD, TOK_PAD)  (combined_table @ W_h)^T, zero-padded
    bh_ref   : VMEM f32 (H_PAD, 1)        hidden bias column, zero-padded
    wo_ref   : VMEM f32 (H_PAD, 1)        output-head weight column, zero-padded
    out_ref  : VMEM f32 (1, B_PAD)        logits, query index in the lane dim
    """
    ent = ent_ref[...]                                     # (1, B_PAD)
    prop = prop_ref[...]                                   # (1, B_PAD)
    tok = lax.broadcasted_iota(jnp.int32, (TOK_PAD, B_PAD), 0)
    # Two-hot selection matrix: column q has 1.0 at rows ent[q] and prop[q].
    two_hot = jnp.logical_or(tok == ent, tok == prop).astype(jnp.float32)

    # Gather fused with the (pre-folded) hidden layer: one full MXU push.
    h = jnp.dot(t2t_ref[...], two_hot,
                preferred_element_type=jnp.float32)        # (H_PAD, B_PAD)
    h = jnp.maximum(h + bh_ref[...], 0.0)                  # bias + ReLU on VPU

    # N=1 output head: VPU multiply + cross-sublane reduce -> lane-dense store.
    out_ref[...] = jnp.sum(h * wo_ref[...], axis=0, keepdims=True)


# ------------------------------ model wrapper --------------------------------
class MysteryModelPallas:
    def __init__(self, n_entities, n_properties, hidden_dim, key):
        self.n_entities = n_entities
        self.n_properties = n_properties
        self.hidden_dim = hidden_dim
        self.tokenizer = MysteryTokenizer()

        H = hidden_dim
        n_tok = n_entities + n_properties
        assert n_tok <= TOK_PAD and H <= H_PAD

        k1, k2, k3, k4, k5 = jax.random.split(key, 5)
        s = 0.2
        # PyTorch Linear stores (out, in); keep already-transposed (in, out) layouts.
        self.W_e = jax.random.normal(k1, (n_entities, H), jnp.float32) * s    # entity_embed.weight.T
        self.W_p = jax.random.normal(k2, (n_properties, H), jnp.float32) * s  # property_embed.weight.T
        self.W_h = jax.random.normal(k3, (2 * H, H), jnp.float32) * s         # hidden_layer.linear.weight.T
        self.b_h = jax.random.normal(k4, (H,), jnp.float32) * s               # hidden_layer.linear.bias
        self.w_o = jax.random.normal(k5, (H,), jnp.float32) * s               # out_head.weight

        # Constant fold: combined table row i (<n_e) = [W_e[i] | 0], row n_e+j = [0 | W_p[j]],
        # so T2 = table @ W_h and T2[ent] + T2[prop] == concat([e, p]) @ W_h.
        t2_ent = self.W_e @ self.W_h[:H, :]                  # (n_entities, H)
        t2_prop = self.W_p @ self.W_h[H:, :]                 # (n_properties, H)
        T2 = jnp.concatenate([t2_ent, t2_prop], axis=0)      # (n_tok, H)

        # Lane-padded, transposed operands for the kernel.
        self.t2t = jnp.zeros((H_PAD, TOK_PAD), jnp.float32).at[:H, :n_tok].set(T2.T)
        self.bh_col = jnp.zeros((H_PAD, 1), jnp.float32).at[:H, 0].set(self.b_h)
        self.wo_col = jnp.zeros((H_PAD, 1), jnp.float32).at[:H, 0].set(self.w_o)

        call = pl.pallas_call(
            mystery_kernel,
            out_shape=jax.ShapeDtypeStruct((1, B_PAD), jnp.float32),
            grid=(1,),
            in_specs=[
                pl.BlockSpec((1, B_PAD), lambda i: (0, 0)),        # entity ids
                pl.BlockSpec((1, B_PAD), lambda i: (0, 0)),        # property ids
                pl.BlockSpec((H_PAD, TOK_PAD), lambda i: (0, 0)),  # folded table^T
                pl.BlockSpec((H_PAD, 1), lambda i: (0, 0)),        # b_h
                pl.BlockSpec((H_PAD, 1), lambda i: (0, 0)),        # w_o
            ],
            out_specs=pl.BlockSpec((1, B_PAD), lambda i: (0, 0)),
            compiler_params=pltpu.CompilerParams(
                dimension_semantics=("arbitrary",)),
        )
        # Single fixed batch bucket -> exactly one compile, reused for every call.
        self._call = jax.jit(
            lambda ent, prop: call(ent, prop, self.t2t, self.bh_col, self.wo_col))

    def logits(self, queries):
        """Batched logits for 'City property ?' strings (chunked in groups of B_PAD)."""
        if isinstance(queries, str):
            queries = [queries]
        results = []
        for start in range(0, len(queries), B_PAD):
            chunk = queries[start:start + B_PAD]
            ent_ids, prop_ids = [], []
            for q in chunk:
                e, p = self.tokenizer.tokenize(q)
                ent_ids.append(e)
                prop_ids.append(self.n_entities + p)   # property rows live after entity rows
            pad = B_PAD - len(chunk)
            ent_ids += [0] * pad                       # valid dummy query; sliced off below
            prop_ids += [self.n_entities] * pad
            ent = jnp.asarray(ent_ids, dtype=jnp.int32).reshape(1, B_PAD)
            prop = jnp.asarray(prop_ids, dtype=jnp.int32).reshape(1, B_PAD)
            out = self._call(ent, prop)                # (1, B_PAD), lane-dense
            results.append(out[0, :len(chunk)])
        return jnp.concatenate(results)

    def forward(self, inputs):
        """Same semantics as MysteryModel.forward: string in, decoded string out."""
        logit = float(jax.block_until_ready(self.logits([inputs]))[0])
        # TODO(synk): round()/decode are host-side Python, as in the PyTorch module.
        return self.tokenizer.decode(round(logit))


# ----------------------------------- main -------------------------------------
if __name__ == "__main__":
    key = jax.random.PRNGKey(0)
    n_entities, n_properties, hidden_dim = 3, 4, 32
    model = MysteryModelPallas(n_entities, n_properties, hidden_dim, key)

    queries = ["Paris language ?", "Rome food ?", "Seattle country ?", "Paris ? ?"]
    logits = jax.block_until_ready(model.logits(queries))

    # Cross-check the kernel against a plain-JAX reference of the original (unfolded) math.
    refs = []
    for q in queries:
        ent, prop = model.tokenizer.tokenize(q)
        x = jnp.concatenate([model.W_e[ent], model.W_p[prop]])      # concat([e, p])
        h = jnp.maximum(x @ model.W_h + model.b_h, 0.0)             # hidden + ReLU
        refs.append(jnp.sum(h * model.w_o))                         # out_head
    refs = jnp.stack(refs)
    assert jnp.allclose(logits, refs, atol=1e-4, rtol=1e-4), (logits, refs)

    decoded = model.forward("Paris language ?")
    assert isinstance(decoded, str)

    print("KERNEL_OK")
</pallas_src>

<mosaic_0001>
module attributes {stable_mosaic.version = 11 : i64} {
  func.func @mystery_kernel(%arg0: i32, %arg1: memref<1x128xi32, #tpu.memory_space<vmem>>, %arg2: memref<1x128xi32, #tpu.memory_space<vmem>>, %arg3: memref<128x128xf32, #tpu.memory_space<vmem>>, %arg4: memref<128x1xf32, #tpu.memory_space<vmem>>, %arg5: memref<128x1xf32, #tpu.memory_space<vmem>>, %arg6: memref<1x128xf32, #tpu.memory_space<vmem>>) attributes {dimension_semantics = [#tpu.dimension_semantics<arbitrary>], iteration_bounds = array<i64: 1>, scalar_prefetch = 0 : i64, scratch_operands = 0 : i64, tpu.core_type = #tpu.core_type<tc>, window_params = [{pipeline_mode = #tpu.pipeline_mode<synchronous>, transform_indices = @transform_0, window_bounds = array<i64: 1, 128>}, {pipeline_mode = #tpu.pipeline_mode<synchronous>, transform_indices = @transform_1, window_bounds = array<i64: 1, 128>}, {pipeline_mode = #tpu.pipeline_mode<synchronous>, transform_indices = @transform_2, window_bounds = array<i64: 128, 128>}, {pipeline_mode = #tpu.pipeline_mode<synchronous>, transform_indices = @transform_3, window_bounds = array<i64: 128, 1>}, {pipeline_mode = #tpu.pipeline_mode<synchronous>, transform_indices = @transform_4, window_bounds = array<i64: 128, 1>}, {pipeline_mode = #tpu.pipeline_mode<synchronous>, transform_indices = @transform_5, window_bounds = array<i64: 1, 128>}]} {
    %c0 = arith.constant 0 : index
    %c0_0 = arith.constant 0 : index
    %0 = vector.load %arg1[%c0, %c0_0] : memref<1x128xi32, #tpu.memory_space<vmem>>, vector<1x128xi32>
    %c0_1 = arith.constant 0 : index
    %c0_2 = arith.constant 0 : index
    %1 = vector.load %arg2[%c0_1, %c0_2] : memref<1x128xi32, #tpu.memory_space<vmem>>, vector<1x128xi32>
    %2 = tpu.iota {dimensions = array<i32: 0>} : vector<128x128xi32>
    %3 = vector.broadcast %0 : vector<1x128xi32> to vector<128x128xi32>
    %4 = arith.cmpi eq, %2, %3 : vector<128x128xi32>
    %5 = vector.broadcast %1 : vector<1x128xi32> to vector<128x128xi32>
    %6 = arith.cmpi eq, %2, %5 : vector<128x128xi32>
    %7 = arith.ori %4, %6 : vector<128x128xi1>
    %8 = arith.extui %7 : vector<128x128xi1> to vector<128x128xi32>
    %9 = arith.sitofp %8 : vector<128x128xi32> to vector<128x128xf32>
    %c0_3 = arith.constant 0 : index
    %c0_4 = arith.constant 0 : index
    %10 = vector.load %arg3[%c0_3, %c0_4] : memref<128x128xf32, #tpu.memory_space<vmem>>, vector<128x128xf32>
    %cst = arith.constant dense<0.000000e+00> : vector<128x128xf32>
    %11 = tpu.matmul %10, %9, %cst {dimension_numbers = #tpu.dot_dimension_numbers<[1], [0], [0], [1], [0, 0, 1, 1], [], []>} : vector<128x128xf32>, vector<128x128xf32>, vector<128x128xf32> -> vector<128x128xf32>
    %c0_5 = arith.constant 0 : index
    %c0_6 = arith.constant 0 : index
    %12 = vector.load %arg4[%c0_5, %c0_6] : memref<128x1xf32, #tpu.memory_space<vmem>>, vector<128x1xf32>
    %13 = vector.broadcast %12 : vector<128x1xf32> to vector<128x128xf32>
    %14 = arith.addf %11, %13 : vector<128x128xf32>
    %cst_7 = arith.constant 0.000000e+00 : f32
    %15 = vector.broadcast %cst_7 : f32 to vector<128x128xf32>
    %16 = arith.maximumf %14, %15 : vector<128x128xf32>
    %c0_8 = arith.constant 0 : index
    %c0_9 = arith.constant 0 : index
    %17 = vector.load %arg5[%c0_8, %c0_9] : memref<128x1xf32, #tpu.memory_space<vmem>>, vector<128x1xf32>
    %18 = vector.broadcast %17 : vector<128x1xf32> to vector<128x128xf32>
    %19 = arith.mulf %16, %18 : vector<128x128xf32>
    %cst_10 = arith.constant dense<0.000000e+00> : vector<128xf32>
    %20 = vector.multi_reduction <add>, %19, %cst_10 [0] : vector<128x128xf32> to vector<128xf32>
    %21 = vector.shape_cast %20 : vector<128xf32> to vector<1x128xf32>
    %c0_11 = arith.constant 0 : index
    %c0_12 = arith.constant 0 : index
    %22 = vector.load %arg6[%c0_11, %c0_12] : memref<1x128xf32, #tpu.memory_space<vmem>>, vector<1x128xf32>
    tpu.vector_store %arg6[%c0_11, %c0_12], %21 {strides = array<i32>} : memref<1x128xf32, #tpu.memory_space<vmem>>, vector<1x128xf32>,
    return
  }
  func.func @transform_0(%arg0: i32) -> (i32, i32) {
    %c0_i32 = arith.constant 0 : i32
    %c0_i32_0 = arith.constant 0 : i32
    %c0_i32_1 = arith.constant 0 : i32
    return %c0_i32, %c0_i32_0 : i32, i32
  }
  func.func @transform_1(%arg0: i32) -> (i32, i32) {
    %c0_i32 = arith.constant 0 : i32
    %c0_i32_0 = arith.constant 0 : i32
    %c0_i32_1 = arith.constant 0 : i32
    return %c0_i32, %c0_i32_0 : i32, i32
  }
  func.func @transform_2(%arg0: i32) -> (i32, i32) {
    %c0_i32 = arith.constant 0 : i32
    %c0_i32_0 = arith.constant 0 : i32
    %c0_i32_1 = arith.constant 0 : i32
    return %c0_i32, %c0_i32_0 : i32, i32
  }
  func.func @transform_3(%arg0: i32) -> (i32, i32) {
    %c0_i32 = arith.constant 0 : i32
    %c0_i32_0 = arith.constant 0 : i32
    %c0_i32_1 = arith.constant 0 : i32
    return %c0_i32, %c0_i32_0 : i32, i32
  }
  func.func @transform_4(%arg0: i32) -> (i32, i32) {
    %c0_i32 = arith.constant 0 : i32
    %c0_i32_0 = arith.constant 0 : i32
    %c0_i32_1 = arith.constant 0 : i32
    return %c0_i32, %c0_i32_0 : i32, i32
  }
  func.func @transform_5(%arg0: i32) -> (i32, i32) {
    %c0_i32 = arith.constant 0 : i32
    %c0_i32_0 = arith.constant 0 : i32
    %c0_i32_1 = arith.constant 0 : i32
    return %c0_i32, %c0_i32_0 : i32, i32
  }
}

</mosaic_0001>

<bundles_post_ra>
// kernel: _lambda_.1
= control target key start
LH: loop header
LB: loop body
LE: loop exit
PB: predicated region body
PF: predicated region fallthrough
CT: control target
= control target key end

     0   :  { %10 = vsyncpa [#allocation3], 0  ;;  %s1180_s0 = inlined_call_operand.hbm [shape: s32[1,128], index: 0, kind: input, shape index: {}]   ;;  %s1181_s1 = inlined_call_operand.vmem [shape: s32[1,128], index: 1, kind: input, shape index: {}]   ;;  %s1182_s2 = inlined_call_operand.hbm [shape: f32[128,128], index: 2, kind: input, shape index: {}]   ;;  %s1183_s3 = inlined_call_operand.hbm [shape: f32[128,1], index: 3, kind: input, shape index: {}]   ;;  %s1184_s4 = inlined_call_operand.hbm [shape: f32[128,1], index: 4, kind: input, shape index: {}]   ;;  %s1185_s5 = inlined_call_operand.hbm [shape: f32[1,128], index: 5, kind: output, shape index: {}]  }
   0x1   :  { %11 = vsyncpa [#allocation6], 0 }
   0x2   :  { %12 = vsyncpa [#allocation9], 0 }
   0x3   :  { %13 = vsyncpa [#allocation4], 0  ;;  %s904_s18 = smov [#allocation5]   ;;  %s786_s22 = scalar_lea.hbm %s1182_s2, 2048 }
   0x4   :  { %s31_s19 = sshll.u32 %s904_s18, 4  ;;  %p787_p0 = scmp.ne.s32.totalorder %s1182_s2, %s786_s22  ;;  %s32_s19 = int_to_ptr.vmem [resolvable:$true] %s31_s19 }
   0x5   :  { %p790_p1 = scmp.lt.u32.totalorder %s786_s22, %s1182_s2 }
   0x7   :  { %p792_p2 = pnand %p790_p1, %p787_p0 }
   0x9   :  { %795 = shalt.err (!%p792_p2)
}
   0xa   :  { %s796_s27 = scalar_lea.vmem %s32_s19, 2048  ;;  %p801_p4 = scmp.lt.s32.totalorder %s32_s19, %s32_s19 }
   0xb   :  { %p797_p3 = scmp.ne.s32.totalorder %s32_s19, %s796_s27  ;;  %p802_p5 = scmp.lt.s32.totalorder %s796_s27, %s796_s27 }
   0xd   :  { %p803_p6 = por %p802_p5, %p801_p4 }
   0xf   :  { %p804_p7 = pnand %p803_p6, %p797_p3 }
  0x11   :  { %807 = shalt.err (!%p804_p7)
}
  0x12   :  { %s905_s28 = smov 128   ;;  %s906_s29 = smov 8  }
  0x13   :  { %37 = dma.hbm_to_vmem [thread:$0]  %s1182_s2, 2048, %s32_s19, [#allocation6], %s905_s28, %s905_s28, %s906_s29  }
  0x14   :  { %s907_s7 = smov [#allocation2]   ;;  %s908_s9 = smov [#allocation7]  }
  0x15   :  { %s20_s8 = sshll.u32 %s907_s7, 4  ;;  %s43_s10 = sshll.u32 %s908_s9, 4  ;;  %s21_s8 = int_to_ptr.vmem [resolvable:$true] %s20_s8  ;;  %s44_s10 = int_to_ptr.vmem [resolvable:$true] %s43_s10 }
  0x16   :  { %s808_s13 = scalar_lea.hbm %s1180_s0, 16 }
  0x17   :  { %p809_p8 = scmp.ne.s32.totalorder %s1180_s0, %s808_s13  ;;  %p812_p9 = scmp.lt.u32.totalorder %s808_s13, %s1180_s0 }
  0x19   :  { %p814_p10 = pnand %p812_p9, %p809_p8 }
  0x1b   :  { %817 = shalt.err (!%p814_p10)
}
  0x1c   :  { %s818_s2 = scalar_lea.vmem %s21_s8, 16  ;;  %s822_s18 = scalar_lea.vmem %s21_s8, 32 }
  0x1d   :  { %p819_p11 = scmp.ne.s32.totalorder %s21_s8, %s818_s2  ;;  %p823_p12 = scmp.lt.s32.totalorder %s21_s8, %s21_s8 }
  0x1e   :  { %p824_p13 = scmp.lt.s32.totalorder %s822_s18, %s818_s2 }
  0x20   :  { %p825_p0 = por %p824_p13, %p823_p12 }
  0x22   :  { %p826_p1 = pnand %p825_p0, %p819_p11 }
  0x24   :  { %829 = shalt.err (!%p826_p1)
}
  0x25   :  { %23 = dma.hbm_to_vmem [thread:$0]  %s1180_s0, 16, %s21_s8, [#allocation3]  }
  0x26   :  { %s830_s23 = scalar_lea.hbm %s1183_s3, 2048 }
  0x27   :  { %p831_p2 = scmp.ne.s32.totalorder %s1183_s3, %s830_s23  ;;  %p834_p3 = scmp.lt.u32.totalorder %s830_s23, %s1183_s3 }
  0x29   :  { %p836_p4 = pnand %p834_p3, %p831_p2 }
  0x2b   :  { %839 = shalt.err (!%p836_p4)
}
  0x2c   :  { %s840_s30 = scalar_lea.vmem %s44_s10, 2048  ;;  %p845_p6 = scmp.lt.s32.totalorder %s44_s10, %s44_s10 }
  0x2d   :  { %p841_p5 = scmp.ne.s32.totalorder %s44_s10, %s840_s30  ;;  %p846_p7 = scmp.lt.s32.totalorder %s840_s30, %s840_s30 }
  0x2f   :  { %p847_p8 = por %p846_p7, %p845_p6 }
  0x31   :  { %p848_p9 = pnand %p847_p8, %p841_p5 }
  0x33   :  { %851 = shalt.err (!%p848_p9)
}
  0x34   :  { %49 = dma.hbm_to_vmem [thread:$0]  %s1183_s3, 2048, %s44_s10, [#allocation6], %s905_s28, %s905_s28, %s906_s29  }
  0x35   :  { %s909_s7 = smov [#allocation8]   ;;  %s852_s12 = scalar_lea.hbm %s1184_s4, 2048 }
  0x36   :  { %s55_s8 = sshll.u32 %s909_s7, 4  ;;  %p853_p10 = scmp.ne.s32.totalorder %s1184_s4, %s852_s12  ;;  %s56_s8 = int_to_ptr.vmem [resolvable:$true] %s55_s8 }
  0x37   :  { %p856_p11 = scmp.lt.u32.totalorder %s852_s12, %s1184_s4 }
  0x39   :  { %p858_p12 = pnand %p856_p11, %p853_p10 }
  0x3b   :  { %861 = shalt.err (!%p858_p12)
}
  0x3c   :  { %s862_s17 = scalar_lea.vmem %s56_s8, 2048  ;;  %p867_p0 = scmp.lt.s32.totalorder %s56_s8, %s56_s8 }
  0x3d   :  { %p863_p13 = scmp.ne.s32.totalorder %s56_s8, %s862_s17  ;;  %p868_p1 = scmp.lt.s32.totalorder %s862_s17, %s862_s17 }
  0x3f   :  { %p869_p2 = por %p868_p1, %p867_p0 }
  0x41   :  { %p870_p3 = pnand %p869_p2, %p863_p13 }
  0x43   :  { %873 = shalt.err (!%p870_p3)
}
  0x44   :  { %61 = dma.hbm_to_vmem [thread:$0]  %s1184_s4, 2048, %s56_s8, [#allocation9], %s905_s28, %s905_s28, %s906_s29  }
  0x45   :  { %896 = dma.done.wait [#allocation3], 16  }
  0x46   :  { %897 = vsyncadd [#allocation3], 4294967280 }
  0x47   :  { %898 = dma.done.wait [#allocation6], 4096  }
  0x48   :  { %899 = vsyncadd [#allocation6], 4294963200 }
  0x49   :  { %900 = dma.done.wait [#allocation9], 2048  }
  0x4a   :  { %901 = vsyncadd [#allocation9], 4294965248  ;;  %v76_v0 = vlaneseq  ;;  %v910_v1 = vmov 0   ;;  %v1005_v6 = vld [vmem:[#allocation2] ss:$0 sm:$0xff]  ;;  %v197_v9 = vld [vmem:[#allocation7] sm:$0xff] }
  0x4b   :  { %784 = vset.pattern.permute.xlu0 %v910_v1  ;;  %785 = vset.pattern.permute.xlu1 %v910_v1  ;;  %v1010_v7 = vld [vmem:[%s1181_s1] ss:$0 sm:$0xff]  ;;  %v199_v10 = vld [vmem:[#allocation7 + $0x10] sm:$0xff]  ;;  %v181_v11 = vld [vmem:[#allocation5] sm:$0xff]  ;;  %v911_v15 = vmov 1.0|1.0  }
  0x4c   :  { %v1000_v2 = vshrl.u32 %v76_v0, 7  ;;  %215 = vperm.xlu0 %784, %v197_v9   ;;  %225 = vperm.xlu1 %785, %v199_v10   ;;  %v189_v14 = vld [vmem:[#allocation5 + $0x40] sm:$0xff]  ;;  %v198_v17 = vld [vmem:[#allocation7 + $0x8] sm:$0xff]  ;;  %v200_v18 = vld [vmem:[#allocation7 + $0x18] sm:$0xff]  ;;  %s912_s1 = smov [#allocation10]  }
  0x4d   :  { %703 = vmatprep.mubr.f32.mxu0 %v181_v11  ;;  %715 = vmatprep.mubr.f32.mxu1 %v189_v14  ;;  %v201_v23 = vld [vmem:[#allocation7 + $0x20] sm:$0xff]  ;;  %v455_v29 = vld [vmem:[#allocation8 + $0x8] sm:$0xff]  ;;  %v456_v30 = vld [vmem:[#allocation8 + $0x10] sm:$0xff]  ;;  %s594_s29 = sshll.u32 %s912_s1, 4  ;;  %s595_s29 = int_to_ptr.vmem [resolvable:$true] %s594_s29 }
  0x4e   :  { %v78_v3 = vadd.s32 8, %v1000_v2  ;;  %v79_v4 = vadd.s32 16, %v1000_v2  ;;  %v80_v5 = vadd.s32 24, %v1000_v2  ;;  %v81_v8 = vadd.s32 32, %v1000_v2  ;;  %v454_v24 = vld [vmem:[#allocation8] sm:$0xff]  ;;  %v202_v35 = vld [vmem:[#allocation7 + $0x28] sm:$0xff]  ;;  %p879_p5 = scmp.lt.s32.totalorder %s595_s29, %s595_s29 }
  0x4f   :  { %vm97_vm0 = vcmp.eq.s32.totalorder %v1000_v2, %v1005_v6  ;;  %vm117_vm2 = vcmp.eq.s32.totalorder %v1000_v2, %v1010_v7  ;;  %v82_v12 = vadd.s32 40, %v1000_v2  ;;  %v83_v13 = vadd.s32 48, %v1000_v2  ;;  %v457_v36 = vld [vmem:[#allocation8 + $0x18] sm:$0xff]  ;;  %v203_v38 = vld [vmem:[#allocation7 + $0x30] sm:$0xff]  ;;  %v458_v39 = vld [vmem:[#allocation8 + $0x20] sm:$0xff]  ;;  %s874_s2 = scalar_lea.vmem %s595_s29, 16 }
  0x50   :  { %vm98_vm1 = vcmp.eq.s32.totalorder %v78_v3, %v1005_v6  ;;  %vm118_vm3 = vcmp.eq.s32.totalorder %v78_v3, %v1010_v7  ;;  %vm133_vm4 = vmor %vm97_vm0, %vm117_vm2  ;;  %vm99_vm5 = vcmp.eq.s32.totalorder %v79_v4, %v1005_v6  ;;  %vm119_vm6 = vcmp.eq.s32.totalorder %v79_v4, %v1010_v7  ;;  %220 = vperm.xlu0 %784, %v198_v17   ;;  %v204_v40 = vld [vmem:[#allocation7 + $0x38] sm:$0xff]  ;;  %v459_v41 = vld [vmem:[#allocation8 + $0x28] sm:$0xff]  ;;  %p875_p4 = scmp.ne.s32.totalorder %s595_s29, %s874_s2  ;;  %s878_s18 = scalar_lea.vmem %s595_s29, 32 }
  0x51   :  { %vm134_vm7 = vmor %vm98_vm1, %vm118_vm3  ;;  %vm100_vm8 = vcmp.eq.s32.totalorder %v80_v5, %v1005_v6  ;;  %vm120_vm9 = vcmp.eq.s32.totalorder %v80_v5, %v1010_v7  ;;  %vm101_vm12 = vcmp.eq.s32.totalorder %v81_v8, %v1005_v6  ;;  %vm121_vm13 = vcmp.eq.s32.totalorder %v81_v8, %v1010_v7  ;;  %230 = vperm.xlu1 %785, %v200_v18   ;;  %v205_v42 = vld [vmem:[#allocation7 + $0x40] sm:$0xff]  ;;  %v460_v43 = vld [vmem:[#allocation8 + $0x30] sm:$0xff]  ;;  %p880_p6 = scmp.lt.s32.totalorder %s878_s18, %s874_s2 }
  0x52   :  { %vm727_vm10 = vmpackc.low %vm134_vm7, %vm133_vm4  ;;  %v84_v16 = vadd.s32 56, %v1000_v2  ;;  %vm102_vm15 = vcmp.eq.s32.totalorder %v82_v12, %v1005_v6  ;;  %vm122_vm0 = vcmp.eq.s32.totalorder %v82_v12, %v1010_v7  ;;  %v85_v19 = vadd.s32 64, %v1000_v2  ;;  %v182_v44 = vld [vmem:[#allocation5 + $0x8] sm:$0xff]  ;;  %v183_v46 = vld [vmem:[#allocation5 + $0x10] sm:$0xff] }
  0x53   :  { %728 = vmatprep.subr.msk.bf16.mxu0 %vm727_vm10, %v911_v15  ;;  %759 = vmatprep.subr.msk.bf16.mxu1 %vm727_vm10, %v911_v15  ;;  %vm135_vm11 = vmor %vm99_vm5, %vm119_vm6  ;;  %vm103_vm3 = vcmp.eq.s32.totalorder %v83_v13, %v1005_v6  ;;  %vm123_vm4 = vcmp.eq.s32.totalorder %v83_v13, %v1010_v7  ;;  %v86_v20 = vadd.s32 72, %v1000_v2  ;;  %v87_v22 = vadd.s32 80, %v1000_v2  ;;  %v190_v45 = vld [vmem:[#allocation5 + $0x48] sm:$0xff]  ;;  %v191_v47 = vld [vmem:[#allocation5 + $0x50] sm:$0xff]  ;;  %p881_p7 = por %p880_p6, %p879_p5 }
  0x54   :  { %730 = vmatpush3.bf16.msk.msra.mxu0 %vm727_vm10, %v911_v15  ;;  %767 = vmatpush3.bf16.msk.msra.mxu1 %vm727_vm10, %v911_v15  ;;  %vm136_vm14 = vmor %vm100_vm8, %vm120_vm9  ;;  %vm104_vm6 = vcmp.eq.s32.totalorder %v84_v16, %v1005_v6  ;;  %vm124_vm7 = vcmp.eq.s32.totalorder %v84_v16, %v1010_v7  ;;  %vm105_vm10 = vcmp.eq.s32.totalorder %v85_v19, %v1005_v6  ;;  %v88_v25 = vadd.s32 88, %v1000_v2  ;;  %v206_v48 = vld [vmem:[#allocation7 + $0x48] sm:$0xff]  ;;  %v461_v49 = vld [vmem:[#allocation8 + $0x38] sm:$0xff] }
  0x55   :  { %vm731_vm1 = vmpackc.low %vm136_vm14, %vm135_vm11  ;;  %vm125_vm11 = vcmp.eq.s32.totalorder %v85_v19, %v1010_v7  ;;  %vm126_vm14 = vcmp.eq.s32.totalorder %v86_v20, %v1010_v7  ;;  %v89_v27 = vadd.s32 96, %v1000_v2  ;;  %235 = vperm.xlu0 %784, %v201_v23   ;;  %472 = vperm.xlu1 %785, %v454_v24   ;;  %v90_v28 = vadd.s32 104, %v1000_v2  ;;  %v184_v50 = vld [vmem:[#allocation5 + $0x18] sm:$0xff]  ;;  %v185_v52 = vld [vmem:[#allocation5 + $0x20] sm:$0xff]  ;;  %p882_p8 = pnand %p881_p7, %p875_p4 }
  0x56   :  { %732 = vmatprep.subr.msk.bf16.mxu0 %vm731_vm1, %v911_v15  ;;  %760 = vmatprep.subr.msk.bf16.mxu1 %vm731_vm1, %v911_v15  ;;  %vm137_vm2 = vmor %vm101_vm12, %vm121_vm13  ;;  %vm106_vm13 = vcmp.eq.s32.totalorder %v86_v20, %v1005_v6  ;;  %v91_v33 = vadd.s32 112, %v1000_v2  ;;  %v92_v34 = vadd.s32 120, %v1000_v2  ;;  %v192_v51 = vld [vmem:[#allocation5 + $0x58] sm:$0xff]  ;;  %v193_v53 = vld [vmem:[#allocation5 + $0x60] sm:$0xff] }
  0x57   :  { %vm138_vm5 = vmor %vm102_vm15, %vm122_vm0  ;;  %v207_v54 = vld [vmem:[#allocation7 + $0x50] sm:$0xff]  ;;  %v462_v55 = vld [vmem:[#allocation8 + $0x40] sm:$0xff] }
  0x58   :  { %734 = vmatpush3.bf16.msk.msra.mxu0 %vm731_vm1, %v911_v15  ;;  %768 = vmatpush3.bf16.msk.msra.mxu1 %vm731_vm1, %v911_v15  ;;  %vm1052_vm8 = vmpackc.low %vm138_vm5, %vm137_vm2  ;;  %vm107_vm1 = vcmp.eq.s32.totalorder %v87_v22, %v1005_v6  ;;  %vm127_vm2 = vcmp.eq.s32.totalorder %v87_v22, %v1010_v7  ;;  %vm128_vm5 = vcmp.eq.s32.totalorder %v88_v25, %v1010_v7  ;;  %v186_v56 = vld [vmem:[#allocation5 + $0x28] sm:$0xff]  ;;  %v187_v58 = vld [vmem:[#allocation5 + $0x30] sm:$0xff] }
  0x59   :  { %736 = vmatprep.subr.msk.bf16.mxu0 %vm1052_vm8, %v911_v15  ;;  %761 = vmatprep.subr.msk.bf16.mxu1 %vm1052_vm8, %v911_v15  ;;  %vm139_vm9 = vmor %vm103_vm3, %vm123_vm4  ;;  %vm108_vm4 = vcmp.eq.s32.totalorder %v88_v25, %v1005_v6  ;;  %v194_v57 = vld [vmem:[#allocation5 + $0x68] sm:$0xff]  ;;  %v195_v59 = vld [vmem:[#allocation5 + $0x70] sm:$0xff] }
  0x5a   :  { %vm140_vm12 = vmor %vm104_vm6, %vm124_vm7  ;;  %477 = vperm.xlu0 %784, %v455_v29   ;;  %482 = vperm.xlu1 %785, %v456_v30   ;;  %v208_v60 = vld [vmem:[#allocation7 + $0x58] sm:$0xff]  ;;  %v463_v61 = vld [vmem:[#allocation8 + $0x48] sm:$0xff] }
  0x5b   :  { %vm1076_vm15 = vmpackc.low %vm140_vm12, %vm139_vm9  ;;  %vm129_vm9 = vcmp.eq.s32.totalorder %v89_v27, %v1010_v7  ;;  %vm130_vm12 = vcmp.eq.s32.totalorder %v90_v28, %v1010_v7  ;;  %v188_v62 = vld [vmem:[#allocation5 + $0x38] sm:$0xff]  ;;  %v209_v0 = vld [vmem:[#allocation7 + $0x60] sm:$0xff] }
  0x5c   :  { %738 = vmatpush3.bf16.msk.msra.mxu0 %vm1052_vm8, %v911_v15  ;;  %769 = vmatpush3.bf16.msk.msra.mxu1 %vm1052_vm8, %v911_v15  ;;  %vm141_vm0 = vmor %vm105_vm10, %vm125_vm11  ;;  %vm109_vm8 = vcmp.eq.s32.totalorder %v89_v27, %v1005_v6  ;;  %vm110_vm11 = vcmp.eq.s32.totalorder %v90_v28, %v1005_v6  ;;  %v196_v63 = vld [vmem:[#allocation5 + $0x78] sm:$0xff]  ;;  %v464_v1 = vld [vmem:[#allocation8 + $0x50] sm:$0xff] }
  0x5d   :  { %740 = vmatprep.subr.msk.bf16.mxu0 %vm1076_vm15, %v911_v15  ;;  %762 = vmatprep.subr.msk.bf16.mxu1 %vm1076_vm15, %v911_v15  ;;  %vm142_vm3 = vmor %vm106_vm13, %vm126_vm14  ;;  %v210_v2 = vld [vmem:[#allocation7 + $0x68] sm:$0xff]  ;;  %v465_v3 = vld [vmem:[#allocation8 + $0x58] sm:$0xff] }
  0x5e   :  { %vm1102_vm6 = vmpackc.low %vm142_vm3, %vm141_vm0  ;;  %vm111_vm0 = vcmp.eq.s32.totalorder %v91_v33, %v1005_v6  ;;  %240 = vperm.xlu0 %784, %v202_v35   ;;  %487 = vperm.xlu1 %785, %v457_v36   ;;  %vm132_vm3 = vcmp.eq.s32.totalorder %v92_v34, %v1010_v7  ;;  %v211_v4 = vld [vmem:[#allocation7 + $0x70] sm:$0xff]  ;;  %v466_v5 = vld [vmem:[#allocation8 + $0x60] sm:$0xff] }
  0x5f   :  { %vm1106_vm7 = vmor %vm107_vm1, %vm127_vm2  ;;  %vm131_vm1 = vcmp.eq.s32.totalorder %v91_v33, %v1010_v7  ;;  %vm112_vm2 = vcmp.eq.s32.totalorder %v92_v34, %v1005_v6  ;;  %v212_v6 = vld [vmem:[#allocation7 + $0x78] sm:$0xff]  ;;  %v467_v7 = vld [vmem:[#allocation8 + $0x68] sm:$0xff] }
  0x60   :  { %742 = vmatpush3.bf16.msk.msra.mxu0 %vm1076_vm15, %v911_v15  ;;  %770 = vmatpush3.bf16.msk.msra.mxu1 %vm1076_vm15, %v911_v15  ;;  %vm144_vm10 = vmor %vm108_vm4, %vm128_vm5  ;;  %v468_v8 = vld [vmem:[#allocation8 + $0x70] sm:$0xff]  ;;  %v469_v9 = vld [vmem:[#allocation8 + $0x78] sm:$0xff] }
  0x61   :  { %744 = vmatprep.subr.msk.bf16.mxu0 %vm1102_vm6, %v911_v15  ;;  %763 = vmatprep.subr.msk.bf16.mxu1 %vm1102_vm6, %v911_v15  ;;  %vm1130_vm13 = vmpackc.low %vm144_vm10, %vm1106_vm7 }
  0x62   :  { %vm145_vm14 = vmor %vm109_vm8, %vm129_vm9  ;;  %245 = vperm.xlu0 %784, %v203_v38   ;;  %492 = vperm.xlu1 %785, %v458_v39  }
  0x63   :  { %vm146_vm15 = vmor %vm110_vm11, %vm130_vm12 }
  0x64   :  { %746 = vmatpush3.bf16.msk.msra.mxu0 %vm1102_vm6, %v911_v15  ;;  %771 = vmatpush3.bf16.msk.msra.mxu1 %vm1102_vm6, %v911_v15  ;;  %vm751_vm4 = vmpackc.low %vm146_vm15, %vm145_vm14 }
  0x65   :  { %748 = vmatprep.subr.msk.bf16.mxu0 %vm1130_vm13, %v911_v15  ;;  %764 = vmatprep.subr.msk.bf16.mxu1 %vm1130_vm13, %v911_v15  ;;  %vm147_vm5 = vmor %vm111_vm0, %vm131_vm1 }
  0x66   :  { %vm148_vm7 = vmor %vm112_vm2, %vm132_vm3  ;;  %250 = vperm.xlu0 %784, %v204_v40   ;;  %497 = vperm.xlu1 %785, %v459_v41  }
  0x67   :  { %vm755_vm6 = vmpackc.low %vm148_vm7, %vm147_vm5 }
  0x68   :  { %750 = vmatpush3.bf16.msk.msra.mxu0 %vm1130_vm13, %v911_v15  ;;  %772 = vmatpush3.bf16.msk.msra.mxu1 %vm1130_vm13, %v911_v15 }
  0x69   :  { %752 = vmatprep.subr.msk.bf16.mxu0 %vm751_vm4, %v911_v15  ;;  %765 = vmatprep.subr.msk.bf16.mxu1 %vm751_vm4, %v911_v15 }
  0x6a   :  { %255 = vperm.xlu0 %784, %v205_v42   ;;  %502 = vperm.xlu1 %785, %v460_v43  }
  0x6c   :  { %754 = vmatpush3.bf16.msk.msra.mxu0 %vm751_vm4, %v911_v15  ;;  %773 = vmatpush3.bf16.msk.msra.mxu1 %vm751_vm4, %v911_v15 }
  0x6d   :  { %756 = vmatprep.subr.msk.bf16.mxu0 %vm755_vm6, %v911_v15  ;;  %766 = vmatprep.subr.msk.bf16.mxu1 %vm755_vm6, %v911_v15 }
  0x6e   :  { %260 = vperm.xlu0 %784, %v206_v48   ;;  %507 = vperm.xlu1 %785, %v461_v49  }
  0x70   :  { %758 = vmatpush3.bf16.msk.msra.mxu0 %vm755_vm6, %v911_v15  ;;  %774 = vmatpush3.bf16.msk.msra.mxu1 %vm755_vm6, %v911_v15 }
  0x72   :  { %265 = vperm.xlu0 %784, %v207_v54   ;;  %512 = vperm.xlu1 %785, %v462_v55  }
  0x73   :  { %704 = vmatmul.mubr.f32.vlgmr.msra.gmra.mrb[0].mxu0 %v182_v44  ;;  %716 = vmatmul.mubr.f32.vlgmr.msra.gmra.mrb[0].mxu1 %v190_v45 }
  0x74   :  { %706 = vmatprep.mubr.f32.mxu0 %v183_v46  ;;  %718 = vmatprep.mubr.f32.mxu1 %v191_v47 }
  0x76   :  { %270 = vperm.xlu0 %784, %v208_v60   ;;  %517 = vperm.xlu1 %785, %v463_v61  }
  0x77   :  { %707 = vmatmul.mubr.f32.gmra.mrb[2].mxu0 %v184_v50  ;;  %719 = vmatmul.mubr.f32.gmra.mrb[2].mxu1 %v192_v51 }
  0x78   :  { %709 = vmatprep.mubr.f32.mxu0 %v185_v52  ;;  %721 = vmatprep.mubr.f32.mxu1 %v193_v53 }
  0x7a   :  { %275 = vperm.xlu0 %784, %v209_v0   ;;  %522 = vperm.xlu1 %785, %v464_v1  }
  0x7b   :  { %710 = vmatmul.mubr.f32.gmra.mrb[4].mxu0 %v186_v56  ;;  %722 = vmatmul.mubr.f32.gmra.mrb[4].mxu1 %v194_v57 }
  0x7c   :  { %712 = vmatprep.mubr.f32.mxu0 %v187_v58  ;;  %724 = vmatprep.mubr.f32.mxu1 %v195_v59 }
  0x7e   :  { %280 = vperm.xlu0 %784, %v210_v2   ;;  %527 = vperm.xlu1 %785, %v465_v3  }
  0x7f   :  { %713 = vmatmul.mubr.f32.gmra.mrb[6].mxu0 %v188_v62  ;;  %725 = vmatmul.mubr.f32.gmra.mrb[6].mxu1 %v196_v63 }
  0x82   :  { %285 = vperm.xlu0 %784, %v211_v4   ;;  %532 = vperm.xlu1 %785, %v466_v5  }
  0x86   :  { %290 = vperm.xlu0 %784, %v212_v6   ;;  %537 = vperm.xlu1 %785, %v467_v7  }
  0x8a   :  { %542 = vperm.xlu0 %784, %v468_v8   ;;  %547 = vperm.xlu1 %785, %v469_v9  }
  0xcb   :  { %v216_v10 = vpop.permute.xlu0 %215  ;;  %v226_v11 = vpop.permute.xlu1 %225 }
  0xcf   :  { %v221_v12 = vpop.permute.xlu0 %220 }
  0xd0   :  { %v231_v13 = vpop.permute.xlu1 %230 }
  0xd4   :  { %v236_v14 = vpop.permute.xlu0 %235  ;;  %v473_v15 = vpop.permute.xlu1 %472 }
  0xd9   :  { %v478_v16 = vpop.permute.xlu0 %477  ;;  %v483_v17 = vpop.permute.xlu1 %482 }
  0xdd   :  { %v241_v18 = vpop.permute.xlu0 %240  ;;  %v488_v19 = vpop.permute.xlu1 %487 }
  0xe1   :  { %v246_v20 = vpop.permute.xlu0 %245  ;;  %v493_v21 = vpop.permute.xlu1 %492 }
  0xe5   :  { %v251_v22 = vpop.permute.xlu0 %250  ;;  %v498_v23 = vpop.permute.xlu1 %497 }
  0xe9   :  { %v256_v24 = vpop.permute.xlu0 %255  ;;  %v503_v25 = vpop.permute.xlu1 %502 }
  0xed   :  { %v261_v26 = vpop.permute.xlu0 %260  ;;  %v508_v27 = vpop.permute.xlu1 %507 }
  0xf1   :  { %v266_v28 = vpop.permute.xlu0 %265  ;;  %v513_v29 = vpop.permute.xlu1 %512 }
  0xf5   :  { %v271_v30 = vpop.permute.xlu0 %270  ;;  %v518_v37 = vpop.permute.xlu1 %517 }
  0xf9   :  { %v276_v48 = vpop.permute.xlu0 %275  ;;  %v523_v59 = vpop.permute.xlu1 %522 }
  0xfd   :  { %v281_v9 = vpop.permute.xlu0 %280 }
 0x146   :  { %v705_v31 = vpop.f32.mrb[0].mxu0  ;;  %v717_v32 = vpop.f32.mrb[0].mxu1 }
 0x147   :  { %v365_v33 = vadd.f32 %v705_v31, %v221_v12  ;;  %v359_v34 = vpop.f32.mrb[1].mxu0  ;;  %v399_v35 = vpop.f32.mrb[1].mxu1 }
 0x148   :  { %v360_v36 = vadd.f32 %v359_v34, %v216_v10  ;;  %v400_v5 = vadd.f32 %v399_v35, %v256_v24  ;;  %v405_v10 = vadd.f32 %v717_v32, %v261_v26 }
 0x149   :  { %v439_v38 = vmax.f32 %v365_v33, 0.0 }
 0x14a   :  { %v438_v39 = vmax.f32 %v360_v36, 0.0  ;;  %v708_v40 = vpop.f32.mrb[2].mxu0  ;;  %v720_v41 = vpop.f32.mrb[2].mxu1  ;;  %v447_v31 = vmax.f32 %v405_v10, 0.0 }
 0x14b   :  { %v551_v42 = vmul.f32 %v478_v16, %v439_v38  ;;  %v375_v43 = vadd.f32 %v708_v40, %v231_v13  ;;  %v369_v44 = vpop.f32.mrb[3].mxu0  ;;  %v409_v45 = vpop.f32.mrb[3].mxu1  ;;  %v446_v16 = vmax.f32 %v400_v5, 0.0  ;;  %v415_v33 = vadd.f32 %v720_v41, %v271_v30 }
 0x14c   :  { %v550_v46 = vmul.f32 %v473_v15, %v438_v39  ;;  %v370_v47 = vadd.f32 %v369_v44, %v226_v11  ;;  %v528_v15 = vpop.permute.xlu1 %527  ;;  %v286_v36 = vpop.permute.xlu0 %285  ;;  %v559_v26 = vmul.f32 %v518_v37, %v447_v31 }
 0x14d   :  { %v441_v50 = vmax.f32 %v375_v43, 0.0  ;;  %v558_v24 = vmul.f32 %v513_v29, %v446_v16 }
 0x14e   :  { %v566_v49 = vadd.f32 %v551_v42, %v550_v46  ;;  %v440_v51 = vmax.f32 %v370_v47, 0.0  ;;  %v711_v52 = vpop.f32.mrb[4].mxu0  ;;  %v723_v53 = vpop.f32.mrb[4].mxu1 }
 0x14f   :  { %v385_v54 = vadd.f32 %v711_v52, %v241_v18  ;;  %v379_v55 = vpop.f32.mrb[5].mxu0  ;;  %v419_v56 = vpop.f32.mrb[5].mxu1  ;;  %v553_v60 = vmul.f32 %v488_v19, %v441_v50  ;;  %v425_v32 = vadd.f32 %v723_v53, %v281_v9 }
 0x150   :  { %v552_v57 = vmul.f32 %v483_v17, %v440_v51  ;;  %v380_v58 = vadd.f32 %v379_v55, %v236_v14  ;;  %v410_v17 = vadd.f32 %v409_v45, %v266_v28  ;;  %v420_v35 = vadd.f32 %v419_v56, %v276_v48  ;;  %v533_v38 = vpop.permute.xlu1 %532 }
 0x151   :  { %v443_v62 = vmax.f32 %v385_v54, 0.0  ;;  %v451_v45 = vmax.f32 %v425_v32, 0.0 }
 0x152   :  { %v567_v61 = vadd.f32 %v566_v49, %v552_v57  ;;  %v442_v63 = vmax.f32 %v380_v58, 0.0  ;;  %v714_v0 = vpop.f32.mrb[6].mxu0  ;;  %v726_v1 = vpop.f32.mrb[6].mxu1  ;;  %v450_v42 = vmax.f32 %v420_v35, 0.0 }
 0x153   :  { %v395_v2 = vadd.f32 %v714_v0, %v251_v22  ;;  %v389_v3 = vpop.f32.mrb[7].mxu0  ;;  %v429_v4 = vpop.f32.mrb[7].mxu1  ;;  %v555_v11 = vmul.f32 %v498_v23, %v443_v62  ;;  %v449_v23 = vmax.f32 %v415_v33, 0.0 }
 0x154   :  { %v554_v6 = vmul.f32 %v493_v21, %v442_v63  ;;  %v568_v7 = vadd.f32 %v567_v61, %v553_v60  ;;  %v390_v8 = vadd.f32 %v389_v3, %v246_v20  ;;  %v448_v21 = vmax.f32 %v410_v17, 0.0  ;;  %v538_v41 = vpop.permute.xlu1 %537 }
 0x155   :  { %v445_v13 = vmax.f32 %v395_v2, 0.0  ;;  %v430_v28 = vadd.f32 %v429_v4, %v286_v36  ;;  %v561_v44 = vmul.f32 %v528_v15, %v449_v23  ;;  %v562_v46 = vmul.f32 %v533_v38, %v450_v42 }
 0x156   :  { %v569_v12 = vadd.f32 %v568_v7, %v554_v6  ;;  %v444_v14 = vmax.f32 %v390_v8, 0.0  ;;  %v560_v40 = vmul.f32 %v523_v59, %v448_v21  ;;  %v563_v48 = vmul.f32 %v538_v41, %v451_v45 }
 0x157   :  { %v557_v22 = vmul.f32 %v508_v27, %v445_v13  ;;  %v452_v29 = vmax.f32 %v430_v28, 0.0 }
 0x158   :  { %v556_v18 = vmul.f32 %v503_v25, %v444_v14  ;;  %v570_v19 = vadd.f32 %v569_v12, %v555_v11  ;;  %v291_v25 = vpop.permute.xlu0 %290  ;;  %v548_v53 = vpop.permute.xlu1 %547 }
 0x159   :  { %v435_v30 = vadd.f32 %v726_v1, %v291_v25 }
 0x15a   :  { %v571_v34 = vadd.f32 %v570_v19, %v556_v18 }
 0x15b   :  { %v453_v49 = vmax.f32 %v435_v30, 0.0 }
 0x15c   :  { %v572_v20 = vadd.f32 %v571_v34, %v557_v22  ;;  %v543_v37 = vpop.permute.xlu0 %542 }
 0x15d   :  { %v564_v51 = vmul.f32 %v543_v37, %v452_v29  ;;  %v565_v54 = vmul.f32 %v548_v53, %v453_v49 }
 0x15e   :  { %v573_v39 = vadd.f32 %v572_v20, %v558_v24 }
 0x160   :  { %v574_v43 = vadd.f32 %v573_v39, %v559_v26 }
 0x162   :  { %v575_v27 = vadd.f32 %v574_v43, %v560_v40 }
 0x164   :  { %v576_v47 = vadd.f32 %v575_v27, %v561_v44 }
 0x166   :  { %v577_v50 = vadd.f32 %v576_v47, %v562_v46 }
 0x168   :  { %v578_v52 = vadd.f32 %v577_v50, %v563_v48 }
 0x16a   :  { %v579_v55 = vadd.f32 %v578_v52, %v564_v51 }
 0x16c   :  { %v580_v56 = vadd.f32 %v579_v55, %v565_v54 }
 0x16e   :  { %v581_v57 = vrot.slane %v580_v56, 4 }
 0x170   :  { %v582_v58 = vadd.f32 %v581_v57, %v580_v56 }
 0x172   :  { %v583_v59 = vrot.slane %v582_v58, 2 }
 0x174   :  { %v584_v60 = vadd.f32 %v583_v59, %v582_v58 }
 0x176   :  { %v585_v61 = vrot.slane %v584_v60, 1 }
 0x178   :  { %v586_v62 = vadd.f32 %v585_v61, %v584_v60 }
 0x17a   :  { %587 = vst [vmem:[#allocation10] sm:$0x1] %v586_v62 }
 0x17b   :  { %885 = shalt.err (!%p882_p8)
}
 0x17c   :  { %s886_s21 = scalar_lea.hbm %s1185_s5, 16 }
 0x17d   :  { %p887_p9 = scmp.ne.s32.totalorder %s1185_s5, %s886_s21  ;;  %p890_p10 = scmp.lt.u32.totalorder %s886_s21, %s1185_s5 }
 0x17f   :  { %p892_p11 = pnand %p890_p10, %p887_p9 }
 0x181   :  { %895 = shalt.err (!%p892_p11)
}
 0x182   :  { %597 = dma.vmem_to_hbm [thread:$0]  %s595_s29, 16, %s1185_s5, [#allocation4]  }
 0x183   :  { %902 = dma.done.wait [#allocation4], 16  }
 0x184   :  { %903 = vsyncadd [#allocation4], 4294967280 }
 0x185   :  { %601 = vsyncpa [#allocation3], 1 }
 0x186   :  { %602 = vsyncpa [#allocation6], 1 }
 0x187   :  { %603 = vsyncpa [#allocation9], 1 }
 0x188   :  { %604 = vsyncpa [#allocation4], 1 }

</bundles_post_ra>
